<compile_context>
chip_gen: v6e
topology: v6e:2x2x1
jax: 0.10.0
libtpu: 0.0.40
codegen_flags: <defaults>
</compile_context>

<pallas_src>
import jax
import jax.numpy as jnp
from jax.experimental import pallas as pl
from jax.experimental.pallas import tpu as pltpu


def _round_up(n, m):
    return ((n + m - 1) // m) * m


def _generator_kernel(x_ref, w1_ref, b1_ref, w2_ref, b2_ref, o_ref):
    # fc1: (Bp, Kp) @ (Kp, 512) + (1, 512), then ReLU.  Recomputed per N-tile
    # (cost is negligible vs streaming the W2 tile).
    h = jnp.dot(x_ref[...], w1_ref[...], preferred_element_type=jnp.float32)
    h = jnp.maximum(h + b1_ref[...].astype(jnp.float32), 0.0)
    # fc2 tile: (Bp, 512) @ (512, TN) + (1, TN)
    out = jnp.dot(h.astype(w2_ref.dtype), w2_ref[...],
                  preferred_element_type=jnp.float32)
    o_ref[...] = (out + b2_ref[...].astype(jnp.float32)).astype(o_ref.dtype)


def generator_forward(x, w1, b1, w2, b2, output_height, output_width, *,
                      tn_max=4096, param_dtype=None):
    """Forward pass of Generator. x: (B, 100) f32. Returns (B, H, W) f32."""
    B, K = x.shape
    hidden = w1.shape[1]
    hw = output_height * output_width
    assert w1.shape == (K, hidden)
    assert w2.shape == (hidden, hw)
    assert b1.shape == (1, hidden) and b2.shape == (1, hw)
    assert hidden % 128 == 0

    if param_dtype is not None:
        w1 = w1.astype(param_dtype)
        w2 = w2.astype(param_dtype)
        x = x.astype(param_dtype)   # tiny (B, 100) cast, done once in wrapper

    # --- layout padding ---------------------------------------------------
    Bp = _round_up(max(B, 8), 8)          # sublane-aligned batch
    Kp = _round_up(K, 128)                # lane/MXU-aligned contraction dim

    # N tiling: single tile when it fits; TN-wide tiles (multiple of 128,
    # capped so double-buffered W2 tiles fit v7x's 64 MiB VMEM) when hw is big.
    assert tn_max % 128 == 0
    hw_128 = _round_up(hw, 128)
    tn = hw_128 if hw_128 <= tn_max else tn_max
    hw_p = _round_up(hw_128, tn)
    n_tiles = hw_p // tn

    x_p = jnp.zeros((Bp, Kp), x.dtype).at[:B, :K].set(x)
    w1_p = jnp.zeros((Kp, hidden), w1.dtype).at[:K, :].set(w1)
    w2_p = jnp.zeros((hidden, hw_p), w2.dtype).at[:, :hw].set(w2)
    b2_p = jnp.zeros((1, hw_p), b2.dtype).at[:, :hw].set(b2)

    # --- pallas call --------------------------------------------------------
    out_flat = pl.pallas_call(
        _generator_kernel,
        out_shape=jax.ShapeDtypeStruct((Bp, hw_p), jnp.float32),
        grid=(n_tiles,),
        in_specs=[
            pl.BlockSpec((Bp, Kp), lambda j: (0, 0)),       # x     (untiled)
            pl.BlockSpec((Kp, hidden), lambda j: (0, 0)),   # W1    (untiled)
            pl.BlockSpec((1, hidden), lambda j: (0, 0)),    # b1    (untiled)
            pl.BlockSpec((hidden, tn), lambda j: (0, j)),   # W2    (N-tiled)
            pl.BlockSpec((1, tn), lambda j: (0, j)),        # b2    (N-tiled)
        ],
        out_specs=pl.BlockSpec((Bp, tn), lambda j: (0, j)),
        compiler_params=pltpu.CompilerParams(
            # Parallel N axis -> v7x can shard tiles across its 2 TensorCores;
            # harmless on single-TC v5e/v6e.
            dimension_semantics=("parallel",),
            # Above the 16/32 MiB scoped defaults, below v7x's 64 MiB physical.
            vmem_limit_bytes=48 * 1024 * 1024,
        ),
    )(x_p, w1_p, b1, w2_p, b2_p)

    return out_flat[:B, :hw].reshape(B, output_height, output_width)


def init_params(key, output_height, output_width):
    """Deterministic init mimicking nn.Linear's uniform(-1/sqrt(fan_in), ...)."""
    hw = output_height * output_width
    k1, k2, k3, k4 = jax.random.split(key, 4)
    bound1 = 1.0 / (100.0 ** 0.5)
    bound2 = 1.0 / (512.0 ** 0.5)
    w1 = jax.random.uniform(k1, (100, 512), jnp.float32, -bound1, bound1)
    b1 = jax.random.uniform(k2, (1, 512), jnp.float32, -bound1, bound1)
    w2 = jax.random.uniform(k3, (512, hw), jnp.float32, -bound2, bound2)
    b2 = jax.random.uniform(k4, (1, hw), jnp.float32, -bound2, bound2)
    return w1, b1, w2, b2


def _reference(x, w1, b1, w2, b2, oh, ow):
    return (jnp.maximum(x @ w1 + b1, 0.0) @ w2 + b2).reshape(-1, oh, ow)


if __name__ == "__main__":
    key = jax.random.PRNGKey(0)
    k_params, k_x = jax.random.split(key)

    # --- primary check: toy size, single grid step, lane-aligned hw --------
    oh, ow = 8, 16           # H*W = 128
    batch = 2
    w1, b1, w2, b2 = init_params(k_params, oh, ow)
    x = jax.random.normal(k_x, (batch, 100), jnp.float32)

    out = generator_forward(x, w1, b1, w2, b2, oh, ow)
    out = jax.block_until_ready(out)
    ref = _reference(x, w1, b1, w2, b2, oh, ow)
    assert out.shape == (batch, oh, ow)
    assert jnp.allclose(out, ref, atol=1e-5, rtol=1e-5)

    # --- secondary check: non-multiple-of-128 hw + multi-tile N grid -------
    oh2, ow2 = 28, 28        # H*W = 784 -> padded to 1024, 4 tiles of 256
    w1b, b1b, w2b, b2b = init_params(k_params, oh2, ow2)
    out2 = generator_forward(x, w1b, b1b, w2b, b2b, oh2, ow2, tn_max=256)
    out2 = jax.block_until_ready(out2)
    ref2 = _reference(x, w1b, b1b, w2b, b2b, oh2, ow2)
    assert out2.shape == (batch, oh2, ow2)
    assert jnp.allclose(out2, ref2, atol=1e-5, rtol=1e-5)

    # --- bf16-weights path (halves dominant W2 HBM traffic at scale) -------
    out3 = generator_forward(x, w1, b1, w2, b2, oh, ow,
                             param_dtype=jnp.bfloat16)
    out3 = jax.block_until_ready(out3)
    assert out3.shape == (batch, oh, ow)
    assert jnp.allclose(out3, ref, atol=3e-2, rtol=3e-2)

    print("KERNEL_OK")
</pallas_src>

<mosaic_0001>
module attributes {stable_mosaic.version = 11 : i64} {
  func.func @_generator_kernel(%arg0: i32, %arg1: memref<8x128xf32, #tpu.memory_space<vmem>>, %arg2: memref<128x512xf32, #tpu.memory_space<vmem>>, %arg3: memref<1x512xf32, #tpu.memory_space<vmem>>, %arg4: memref<512x128xf32, #tpu.memory_space<vmem>>, %arg5: memref<1x128xf32, #tpu.memory_space<vmem>>, %arg6: memref<8x128xf32, #tpu.memory_space<vmem>>) attributes {dimension_semantics = [#tpu.dimension_semantics<parallel>], iteration_bounds = array<i64: 1>, scalar_prefetch = 0 : i64, scratch_operands = 0 : i64, tpu.core_type = #tpu.core_type<tc>, window_params = [{pipeline_mode = #tpu.pipeline_mode<synchronous>, transform_indices = @transform_0, window_bounds = array<i64: 8, 128>}, {pipeline_mode = #tpu.pipeline_mode<synchronous>, transform_indices = @transform_1, window_bounds = array<i64: 128, 512>}, {pipeline_mode = #tpu.pipeline_mode<synchronous>, transform_indices = @transform_2, window_bounds = array<i64: 1, 512>}, {transform_indices = @transform_3, window_bounds = array<i64: 512, 128>}, {transform_indices = @transform_4, window_bounds = array<i64: 1, 128>}, {transform_indices = @transform_5, window_bounds = array<i64: 8, 128>}]} {
    %c0 = arith.constant 0 : index
    %c0_0 = arith.constant 0 : index
    %0 = vector.load %arg1[%c0, %c0_0] : memref<8x128xf32, #tpu.memory_space<vmem>>, vector<8x128xf32>
    %c0_1 = arith.constant 0 : index
    %c0_2 = arith.constant 0 : index
    %1 = vector.load %arg2[%c0_1, %c0_2] : memref<128x512xf32, #tpu.memory_space<vmem>>, vector<128x512xf32>
    %cst = arith.constant dense<0.000000e+00> : vector<8x512xf32>
    %2 = tpu.matmul %0, %1, %cst {dimension_numbers = #tpu.dot_dimension_numbers<[1], [0], [0], [1], [0, 0, 1, 1], [], []>} : vector<8x128xf32>, vector<128x512xf32>, vector<8x512xf32> -> vector<8x512xf32>
    %c0_3 = arith.constant 0 : index
    %c0_4 = arith.constant 0 : index
    %3 = vector.load %arg3[%c0_3, %c0_4] : memref<1x512xf32, #tpu.memory_space<vmem>>, vector<1x512xf32>
    %4 = vector.broadcast %3 : vector<1x512xf32> to vector<8x512xf32>
    %5 = arith.addf %2, %4 : vector<8x512xf32>
    %cst_5 = arith.constant 0.000000e+00 : f32
    %6 = vector.broadcast %cst_5 : f32 to vector<8x512xf32>
    %7 = arith.maximumf %5, %6 : vector<8x512xf32>
    %c0_6 = arith.constant 0 : index
    %c0_7 = arith.constant 0 : index
    %8 = vector.load %arg4[%c0_6, %c0_7] : memref<512x128xf32, #tpu.memory_space<vmem>>, vector<512x128xf32>
    %cst_8 = arith.constant dense<0.000000e+00> : vector<8x128xf32>
    %9 = tpu.matmul %7, %8, %cst_8 {dimension_numbers = #tpu.dot_dimension_numbers<[1], [0], [0], [1], [0, 0, 1, 1], [], []>} : vector<8x512xf32>, vector<512x128xf32>, vector<8x128xf32> -> vector<8x128xf32>
    %c0_9 = arith.constant 0 : index
    %c0_10 = arith.constant 0 : index
    %10 = vector.load %arg5[%c0_9, %c0_10] : memref<1x128xf32, #tpu.memory_space<vmem>>, vector<1x128xf32>
    %11 = vector.broadcast %10 : vector<1x128xf32> to vector<8x128xf32>
    %12 = arith.addf %9, %11 : vector<8x128xf32>
    %c0_11 = arith.constant 0 : index
    %c0_12 = arith.constant 0 : index
    %13 = vector.load %arg6[%c0_11, %c0_12] : memref<8x128xf32, #tpu.memory_space<vmem>>, vector<8x128xf32>
    tpu.vector_store %arg6[%c0_11, %c0_12], %12 {strides = array<i32>} : memref<8x128xf32, #tpu.memory_space<vmem>>, vector<8x128xf32>,
    return
  }
  func.func @transform_0(%arg0: i32) -> (i32, i32) {
    %c0_i32 = arith.constant 0 : i32
    %c0_i32_0 = arith.constant 0 : i32
    %c0_i32_1 = arith.constant 0 : i32
    return %c0_i32, %c0_i32_0 : i32, i32
  }
  func.func @transform_1(%arg0: i32) -> (i32, i32) {
    %c0_i32 = arith.constant 0 : i32
    %c0_i32_0 = arith.constant 0 : i32
    %c0_i32_1 = arith.constant 0 : i32
    return %c0_i32, %c0_i32_0 : i32, i32
  }
  func.func @transform_2(%arg0: i32) -> (i32, i32) {
    %c0_i32 = arith.constant 0 : i32
    %c0_i32_0 = arith.constant 0 : i32
    %c0_i32_1 = arith.constant 0 : i32
    return %c0_i32, %c0_i32_0 : i32, i32
  }
  func.func @transform_3(%arg0: i32) -> (i32, i32) {
    %c0_i32 = arith.constant 0 : i32
    %c0_i32_0 = arith.constant 0 : i32
    return %c0_i32, %arg0 : i32, i32
  }
  func.func @transform_4(%arg0: i32) -> (i32, i32) {
    %c0_i32 = arith.constant 0 : i32
    %c0_i32_0 = arith.constant 0 : i32
    return %c0_i32, %arg0 : i32, i32
  }
  func.func @transform_5(%arg0: i32) -> (i32, i32) {
    %c0_i32 = arith.constant 0 : i32
    %c0_i32_0 = arith.constant 0 : i32
    return %c0_i32, %arg0 : i32, i32
  }
}

</mosaic_0001>

<bundles_post_ra>
// kernel: tpu_custom_call.1
= control target key start
LH: loop header
LB: loop body
LE: loop exit
PB: predicated region body
PF: predicated region fallthrough
CT: control target
= control target key end

     0   :  { %10 = vsyncpa [#allocation3], 0  ;;  %s781_s0 = inlined_call_operand.hbm [shape: f32[8,128], index: 0, kind: input, shape index: {}]   ;;  %s782_s1 = inlined_call_operand.hbm [shape: f32[128,512], index: 1, kind: input, shape index: {}]   ;;  %s783_s2 = inlined_call_operand.hbm [shape: f32[1,512], index: 2, kind: input, shape index: {}]   ;;  %s784_s3 = inlined_call_operand.hbm [shape: f32[512,128], index: 3, kind: input, shape index: {}]   ;;  %s785_s4 = inlined_call_operand.vmem [shape: f32[1,128], index: 4, kind: input, shape index: {}]   ;;  %s786_s5 = inlined_call_operand.hbm [shape: f32[8,128], index: 5, kind: output, shape index: {}]  }
   0x1   :  { %11 = vsyncpa [#allocation6], 0 }
   0x2   :  { %12 = vsyncpa [#allocation9], 0 }
   0x3   :  { %13 = vsyncpa [#allocation4], 0  ;;  %s723_s18 = smov [#allocation5]  }
   0x4   :  { %s29_s19 = sshll.u32 %s723_s18, 4  ;;  %s30_s19 = int_to_ptr.vmem [resolvable:$true] %s29_s19 }
   0x5   :  { %s623_s20 = scalar_lea.vmem %s30_s19, 8192  ;;  %p628_p1 = scmp.lt.s32.totalorder %s30_s19, %s30_s19 }
   0x6   :  { %p624_p0 = scmp.ne.s32.totalorder %s30_s19, %s623_s20  ;;  %p629_p2 = scmp.lt.s32.totalorder %s623_s20, %s623_s20 }
   0x8   :  { %p630_p3 = por %p629_p2, %p628_p1 }
   0xa   :  { %p631_p4 = pnand %p630_p3, %p624_p0 }
   0xc   :  { %634 = shalt.err (!%p631_p4)
}
   0xd   :  { %s724_s21 = smov 512   ;;  %s725_s22 = smov 32  }
   0xe   :  { %35 = dma.hbm_to_vmem [thread:$0]  %s782_s1, 8192, %s30_s19, [#allocation6], %s724_s21, %s724_s21, %s725_s22  }
   0xf   :  { %s726_s25 = smov [#allocation2]   ;;  %s727_s27 = smov [#allocation7]  }
  0x10   :  { %s20_s26 = sshll.u32 %s726_s25, 4  ;;  %s42_s28 = sshll.u32 %s727_s27, 4  ;;  %s21_s26 = int_to_ptr.vmem [resolvable:$true] %s20_s26  ;;  %s43_s28 = int_to_ptr.vmem [resolvable:$true] %s42_s28 }
  0x11   :  { %s643_s29 = scalar_lea.vmem %s21_s26, 128  ;;  %p648_p6 = scmp.lt.s32.totalorder %s21_s26, %s21_s26 }
  0x12   :  { %p644_p5 = scmp.ne.s32.totalorder %s21_s26, %s643_s29  ;;  %p649_p7 = scmp.lt.s32.totalorder %s643_s29, %s643_s29 }
  0x14   :  { %p650_p8 = por %p649_p7, %p648_p6 }
  0x16   :  { %p651_p9 = pnand %p650_p8, %p644_p5 }
  0x18   :  { %654 = shalt.err (!%p651_p9)
}
  0x19   :  { %23 = dma.hbm_to_vmem [thread:$0]  %s781_s0, 128, %s21_s26, [#allocation3]  }
  0x1a   :  { %s663_s7 = scalar_lea.vmem %s43_s28, 64  ;;  %p668_p11 = scmp.lt.s32.totalorder %s43_s28, %s43_s28 }
  0x1b   :  { %p664_p10 = scmp.ne.s32.totalorder %s43_s28, %s663_s7  ;;  %p669_p12 = scmp.lt.s32.totalorder %s663_s7, %s663_s7 }
  0x1d   :  { %p670_p13 = por %p669_p12, %p668_p11 }
  0x1f   :  { %p671_p0 = pnand %p670_p13, %p664_p10 }
  0x21   :  { %674 = shalt.err (!%p671_p0)
}
  0x22   :  { %45 = dma.hbm_to_vmem [thread:$0]  %s783_s2, 64, %s43_s28, [#allocation6]  }
  0x23   :  { %s728_s9 = smov [#allocation8]  }
  0x24   :  { %s51_s10 = sshll.u32 %s728_s9, 4  ;;  %s52_s10 = int_to_ptr.vmem [resolvable:$true] %s51_s10 }
  0x25   :  { %s683_s11 = scalar_lea.vmem %s52_s10, 8192  ;;  %p688_p2 = scmp.lt.s32.totalorder %s52_s10, %s52_s10 }
  0x26   :  { %p684_p1 = scmp.ne.s32.totalorder %s52_s10, %s683_s11  ;;  %p689_p3 = scmp.lt.s32.totalorder %s683_s11, %s683_s11 }
  0x28   :  { %p690_p4 = por %p689_p3, %p688_p2 }
  0x2a   :  { %p691_p5 = pnand %p690_p4, %p684_p1 }
  0x2c   :  { %694 = shalt.err (!%p691_p5)
}
  0x2d   :  { %s729_s0 = smov 128   ;;  %s730_s12 = smov 8  }
  0x2e   :  { %57 = dma.hbm_to_vmem [thread:$0]  %s784_s3, 8192, %s52_s10, [#allocation9], %s729_s0, %s729_s0, %s730_s12  }
  0x2f   :  { %715 = dma.done.wait [#allocation3], 128  }
  0x30   :  { %716 = vsyncadd [#allocation3], 4294967168 }
  0x31   :  { %717 = dma.done.wait [#allocation6], 8256  }
  0x32   :  { %718 = vsyncadd [#allocation6], 4294959040 }
  0x33   :  { %719 = dma.done.wait [#allocation9], 8192  }
  0x34   :  { %720 = vsyncadd [#allocation9], 4294959104  ;;  %v731_v0 = vmov 0.0   ;;  %v134_v1 = vld [vmem:[#allocation5 + $0x1e8] sm:$0xff]  ;;  %v136_v2 = vld [vmem:[#allocation5 + $0x1f8] sm:$0xff]  ;;  %s732_s15 = smov [#allocation10]  }
  0x35   :  { %223 = vmatprep.mubr.f32.mxu0 %v731_v0  ;;  %294 = vmatprep.mubr.f32.mxu1 %v731_v0  ;;  %v133_v3 = vld [vmem:[#allocation5 + $0x1e0] sm:$0xff]  ;;  %v135_v4 = vld [vmem:[#allocation5 + $0x1f0] sm:$0xff]  ;;  %v130_v5 = vld [vmem:[#allocation5 + $0x1c8] sm:$0xff]  ;;  %s523_s16 = sshll.u32 %s732_s15, 4  ;;  %s524_s16 = int_to_ptr.vmem [resolvable:$true] %s523_s16 }
  0x36   :  { %159 = vmatprep.subr.mxu0 %v134_v1  ;;  %230 = vmatprep.subr.mxu1 %v136_v2  ;;  %v132_v6 = vld [vmem:[#allocation5 + $0x1d8] sm:$0xff]  ;;  %v129_v7 = vld [vmem:[#allocation5 + $0x1c0] sm:$0xff]  ;;  %v131_v8 = vld [vmem:[#allocation5 + $0x1d0] sm:$0xff]  ;;  %s695_s17 = scalar_lea.vmem %s524_s16, 128  ;;  %p700_p7 = scmp.lt.s32.totalorder %s524_s16, %s524_s16 }
  0x37   :  { %160 = vmatpush1.msra.mxu0 %v133_v3  ;;  %231 = vmatpush1.msra.mxu1 %v135_v4  ;;  %v126_v9 = vld [vmem:[#allocation5 + $0x1a8] sm:$0xff]  ;;  %v128_v10 = vld [vmem:[#allocation5 + $0x1b8] sm:$0xff]  ;;  %v125_v11 = vld [vmem:[#allocation5 + $0x1a0] sm:$0xff]  ;;  %p696_p6 = scmp.ne.s32.totalorder %s524_s16, %s695_s17  ;;  %p701_p8 = scmp.lt.s32.totalorder %s695_s17, %s695_s17 }
  0x38   :  { %161 = vmatprep.subr.mxu0 %v130_v5  ;;  %232 = vmatprep.subr.mxu1 %v132_v6  ;;  %v127_v12 = vld [vmem:[#allocation5 + $0x1b0] sm:$0xff]  ;;  %v122_v13 = vld [vmem:[#allocation5 + $0x188] sm:$0xff]  ;;  %v124_v14 = vld [vmem:[#allocation5 + $0x198] sm:$0xff] }
  0x39   :  { %162 = vmatpush1.msra.mxu0 %v129_v7  ;;  %233 = vmatpush1.msra.mxu1 %v131_v8  ;;  %v121_v15 = vld [vmem:[#allocation5 + $0x180] sm:$0xff]  ;;  %v123_v16 = vld [vmem:[#allocation5 + $0x190] sm:$0xff]  ;;  %v118_v17 = vld [vmem:[#allocation5 + $0x168] sm:$0xff]  ;;  %p702_p9 = por %p701_p8, %p700_p7 }
  0x3a   :  { %163 = vmatprep.subr.mxu0 %v126_v9  ;;  %234 = vmatprep.subr.mxu1 %v128_v10  ;;  %v120_v18 = vld [vmem:[#allocation5 + $0x178] sm:$0xff]  ;;  %v117_v19 = vld [vmem:[#allocation5 + $0x160] sm:$0xff]  ;;  %v119_v20 = vld [vmem:[#allocation5 + $0x170] sm:$0xff] }
  0x3b   :  { %164 = vmatpush1.msra.mxu0 %v125_v11  ;;  %235 = vmatpush1.msra.mxu1 %v127_v12  ;;  %v114_v21 = vld [vmem:[#allocation5 + $0x148] sm:$0xff]  ;;  %v116_v22 = vld [vmem:[#allocation5 + $0x158] sm:$0xff]  ;;  %v113_v23 = vld [vmem:[#allocation5 + $0x140] sm:$0xff]  ;;  %p703_p10 = pnand %p702_p9, %p696_p6 }
  0x3c   :  { %165 = vmatprep.subr.mxu0 %v122_v13  ;;  %236 = vmatprep.subr.mxu1 %v124_v14  ;;  %v115_v24 = vld [vmem:[#allocation5 + $0x150] sm:$0xff]  ;;  %v110_v25 = vld [vmem:[#allocation5 + $0x128] sm:$0xff]  ;;  %v112_v26 = vld [vmem:[#allocation5 + $0x138] sm:$0xff] }
  0x3d   :  { %166 = vmatpush1.msra.mxu0 %v121_v15  ;;  %237 = vmatpush1.msra.mxu1 %v123_v16  ;;  %v109_v27 = vld [vmem:[#allocation5 + $0x120] sm:$0xff]  ;;  %v111_v28 = vld [vmem:[#allocation5 + $0x130] sm:$0xff]  ;;  %v106_v29 = vld [vmem:[#allocation5 + $0x108] sm:$0xff] }
  0x3e   :  { %167 = vmatprep.subr.mxu0 %v118_v17  ;;  %238 = vmatprep.subr.mxu1 %v120_v18  ;;  %v108_v30 = vld [vmem:[#allocation5 + $0x118] sm:$0xff]  ;;  %v105_v31 = vld [vmem:[#allocation5 + $0x100] sm:$0xff]  ;;  %v107_v32 = vld [vmem:[#allocation5 + $0x110] sm:$0xff] }
  0x3f   :  { %168 = vmatpush1.msra.mxu0 %v117_v19  ;;  %239 = vmatpush1.msra.mxu1 %v119_v20  ;;  %v102_v33 = vld [vmem:[#allocation5 + $0xe8] sm:$0xff]  ;;  %v104_v34 = vld [vmem:[#allocation5 + $0xf8] sm:$0xff]  ;;  %v101_v35 = vld [vmem:[#allocation5 + $0xe0] sm:$0xff] }
  0x40   :  { %169 = vmatprep.subr.mxu0 %v114_v21  ;;  %240 = vmatprep.subr.mxu1 %v116_v22  ;;  %v103_v36 = vld [vmem:[#allocation5 + $0xf0] sm:$0xff]  ;;  %v98_v37 = vld [vmem:[#allocation5 + $0xc8] sm:$0xff]  ;;  %v100_v38 = vld [vmem:[#allocation5 + $0xd8] sm:$0xff] }
  0x41   :  { %170 = vmatpush1.msra.mxu0 %v113_v23  ;;  %241 = vmatpush1.msra.mxu1 %v115_v24  ;;  %v97_v39 = vld [vmem:[#allocation5 + $0xc0] sm:$0xff]  ;;  %v99_v40 = vld [vmem:[#allocation5 + $0xd0] sm:$0xff]  ;;  %v94_v41 = vld [vmem:[#allocation5 + $0xa8] sm:$0xff] }
  0x42   :  { %171 = vmatprep.subr.mxu0 %v110_v25  ;;  %242 = vmatprep.subr.mxu1 %v112_v26  ;;  %v96_v42 = vld [vmem:[#allocation5 + $0xb8] sm:$0xff]  ;;  %v93_v43 = vld [vmem:[#allocation5 + $0xa0] sm:$0xff]  ;;  %v95_v44 = vld [vmem:[#allocation5 + $0xb0] sm:$0xff] }
  0x43   :  { %172 = vmatpush1.msra.mxu0 %v109_v27  ;;  %243 = vmatpush1.msra.mxu1 %v111_v28  ;;  %v90_v45 = vld [vmem:[#allocation5 + $0x88] sm:$0xff]  ;;  %v92_v46 = vld [vmem:[#allocation5 + $0x98] sm:$0xff]  ;;  %v89_v47 = vld [vmem:[#allocation5 + $0x80] sm:$0xff] }
  0x44   :  { %173 = vmatprep.subr.mxu0 %v106_v29  ;;  %244 = vmatprep.subr.mxu1 %v108_v30  ;;  %v91_v48 = vld [vmem:[#allocation5 + $0x90] sm:$0xff]  ;;  %v86_v49 = vld [vmem:[#allocation5 + $0x68] sm:$0xff]  ;;  %v88_v50 = vld [vmem:[#allocation5 + $0x78] sm:$0xff] }
  0x45   :  { %174 = vmatpush1.msra.mxu0 %v105_v31  ;;  %245 = vmatpush1.msra.mxu1 %v107_v32  ;;  %v85_v51 = vld [vmem:[#allocation5 + $0x60] sm:$0xff]  ;;  %v87_v52 = vld [vmem:[#allocation5 + $0x70] sm:$0xff]  ;;  %v82_v53 = vld [vmem:[#allocation5 + $0x48] sm:$0xff] }
  0x46   :  { %175 = vmatprep.subr.mxu0 %v102_v33  ;;  %246 = vmatprep.subr.mxu1 %v104_v34  ;;  %v84_v54 = vld [vmem:[#allocation5 + $0x58] sm:$0xff]  ;;  %v81_v55 = vld [vmem:[#allocation5 + $0x40] sm:$0xff]  ;;  %v83_v56 = vld [vmem:[#allocation5 + $0x50] sm:$0xff] }
  0x47   :  { %176 = vmatpush1.msra.mxu0 %v101_v35  ;;  %247 = vmatpush1.msra.mxu1 %v103_v36  ;;  %v78_v57 = vld [vmem:[#allocation5 + $0x28] sm:$0xff]  ;;  %v80_v58 = vld [vmem:[#allocation5 + $0x38] sm:$0xff]  ;;  %v77_v59 = vld [vmem:[#allocation5 + $0x20] sm:$0xff] }
  0x48   :  { %177 = vmatprep.subr.mxu0 %v98_v37  ;;  %248 = vmatprep.subr.mxu1 %v100_v38  ;;  %v79_v60 = vld [vmem:[#allocation5 + $0x30] sm:$0xff]  ;;  %v74_v61 = vld [vmem:[#allocation5 + $0x8] sm:$0xff]  ;;  %v76_v62 = vld [vmem:[#allocation5 + $0x18] sm:$0xff] }
  0x49   :  { %178 = vmatpush1.msra.mxu0 %v97_v39  ;;  %249 = vmatpush1.msra.mxu1 %v99_v40  ;;  %v73_v63 = vld [vmem:[#allocation5] sm:$0xff]  ;;  %v75_v0 = vld [vmem:[#allocation5 + $0x10] sm:$0xff]  ;;  %v72_v1 = vld [vmem:[#allocation2] sm:$0xff] }
  0x4a   :  { %179 = vmatprep.subr.mxu0 %v94_v41  ;;  %250 = vmatprep.subr.mxu1 %v96_v42  ;;  %v336_v2 = vld [vmem:[#allocation8 + $0xf8] sm:$0xff]  ;;  %v335_v6 = vld [vmem:[#allocation8 + $0xf0] sm:$0xff]  ;;  %v334_v10 = vld [vmem:[#allocation8 + $0xe8] sm:$0xff] }
  0x4b   :  { %180 = vmatpush1.msra.mxu0 %v93_v43  ;;  %251 = vmatpush1.msra.mxu1 %v95_v44  ;;  %v368_v3 = vld [vmem:[#allocation8 + $0x1f8] sm:$0xff]  ;;  %v367_v7 = vld [vmem:[#allocation8 + $0x1f0] sm:$0xff]  ;;  %v366_v11 = vld [vmem:[#allocation8 + $0x1e8] sm:$0xff] }
  0x4c   :  { %181 = vmatprep.subr.mxu0 %v90_v45  ;;  %252 = vmatprep.subr.mxu1 %v92_v46  ;;  %v320_v4 = vld [vmem:[#allocation8 + $0x78] sm:$0xff]  ;;  %v319_v8 = vld [vmem:[#allocation8 + $0x70] sm:$0xff]  ;;  %v318_v12 = vld [vmem:[#allocation8 + $0x68] sm:$0xff] }
  0x4d   :  { %182 = vmatpush1.msra.mxu0 %v89_v47  ;;  %253 = vmatpush1.msra.mxu1 %v91_v48  ;;  %v352_v5 = vld [vmem:[#allocation8 + $0x178] sm:$0xff]  ;;  %v351_v9 = vld [vmem:[#allocation8 + $0x170] sm:$0xff]  ;;  %v350_v13 = vld [vmem:[#allocation8 + $0x168] sm:$0xff] }
  0x4e   :  { %183 = vmatprep.subr.mxu0 %v86_v49  ;;  %254 = vmatprep.subr.mxu1 %v88_v50  ;;  %v333_v14 = vld [vmem:[#allocation8 + $0xe0] sm:$0xff]  ;;  %v332_v18 = vld [vmem:[#allocation8 + $0xd8] sm:$0xff]  ;;  %v331_v22 = vld [vmem:[#allocation8 + $0xd0] sm:$0xff] }
  0x4f   :  { %184 = vmatpush1.msra.mxu0 %v85_v51  ;;  %255 = vmatpush1.msra.mxu1 %v87_v52  ;;  %v365_v15 = vld [vmem:[#allocation8 + $0x1e0] sm:$0xff]  ;;  %v364_v19 = vld [vmem:[#allocation8 + $0x1d8] sm:$0xff]  ;;  %v363_v23 = vld [vmem:[#allocation8 + $0x1d0] sm:$0xff] }
  0x50   :  { %185 = vmatprep.subr.mxu0 %v82_v53  ;;  %256 = vmatprep.subr.mxu1 %v84_v54  ;;  %v317_v16 = vld [vmem:[#allocation8 + $0x60] sm:$0xff]  ;;  %v316_v20 = vld [vmem:[#allocation8 + $0x58] sm:$0xff]  ;;  %v315_v24 = vld [vmem:[#allocation8 + $0x50] sm:$0xff] }
  0x51   :  { %186 = vmatpush1.msra.mxu0 %v81_v55  ;;  %257 = vmatpush1.msra.mxu1 %v83_v56  ;;  %v349_v17 = vld [vmem:[#allocation8 + $0x160] sm:$0xff]  ;;  %v348_v21 = vld [vmem:[#allocation8 + $0x158] sm:$0xff]  ;;  %v347_v25 = vld [vmem:[#allocation8 + $0x150] sm:$0xff] }
  0x52   :  { %187 = vmatprep.subr.mxu0 %v78_v57  ;;  %258 = vmatprep.subr.mxu1 %v80_v58  ;;  %v330_v26 = vld [vmem:[#allocation8 + $0xc8] sm:$0xff]  ;;  %v329_v30 = vld [vmem:[#allocation8 + $0xc0] sm:$0xff]  ;;  %v328_v34 = vld [vmem:[#allocation8 + $0xb8] sm:$0xff] }
  0x53   :  { %188 = vmatpush1.msra.mxu0 %v77_v59  ;;  %259 = vmatpush1.msra.mxu1 %v79_v60  ;;  %v362_v27 = vld [vmem:[#allocation8 + $0x1c8] sm:$0xff]  ;;  %v361_v31 = vld [vmem:[#allocation8 + $0x1c0] sm:$0xff]  ;;  %v360_v35 = vld [vmem:[#allocation8 + $0x1b8] sm:$0xff] }
  0x54   :  { %189 = vmatprep.subr.mxu0 %v74_v61  ;;  %260 = vmatprep.subr.mxu1 %v76_v62  ;;  %v314_v28 = vld [vmem:[#allocation8 + $0x48] sm:$0xff]  ;;  %v313_v32 = vld [vmem:[#allocation8 + $0x40] sm:$0xff]  ;;  %v312_v36 = vld [vmem:[#allocation8 + $0x38] sm:$0xff] }
  0x55   :  { %190 = vmatpush1.msra.mxu0 %v73_v63  ;;  %261 = vmatpush1.msra.mxu1 %v75_v0  ;;  %v346_v29 = vld [vmem:[#allocation8 + $0x148] sm:$0xff]  ;;  %v345_v33 = vld [vmem:[#allocation8 + $0x140] sm:$0xff]  ;;  %v344_v37 = vld [vmem:[#allocation8 + $0x138] sm:$0xff] }
  0x56   :  { %224 = vmatmul.mubr.f32.vlgmr.msra.gmra.mxu0 %v72_v1  ;;  %295 = vmatmul.mubr.f32.vlgmr.msra.gmra.mxu1 %v72_v1  ;;  %v327_v38 = vld [vmem:[#allocation8 + $0xb0] sm:$0xff]  ;;  %v326_v42 = vld [vmem:[#allocation8 + $0xa8] sm:$0xff]  ;;  %v325_v46 = vld [vmem:[#allocation8 + $0xa0] sm:$0xff] }
  0x57   :  { %535 = vmatprep.subr.mxu0 %v336_v2  ;;  %570 = vmatprep.subr.mxu1 %v368_v3  ;;  %v359_v39 = vld [vmem:[#allocation8 + $0x1b0] sm:$0xff]  ;;  %v358_v43 = vld [vmem:[#allocation8 + $0x1a8] sm:$0xff]  ;;  %v357_v47 = vld [vmem:[#allocation8 + $0x1a0] sm:$0xff]  ;;  %v139_v2 = vlaneseq }
  0x58   :  { %536 = vmatpush3.msra.mxu0 %v320_v4  ;;  %571 = vmatpush3.msra.mxu1 %v352_v5  ;;  %v311_v40 = vld [vmem:[#allocation8 + $0x30] sm:$0xff]  ;;  %v310_v44 = vld [vmem:[#allocation8 + $0x28] sm:$0xff]  ;;  %v309_v48 = vld [vmem:[#allocation8 + $0x20] sm:$0xff] }
  0x59   :  { %537 = vmatprep.subr.mxu0 %v335_v6  ;;  %572 = vmatprep.subr.mxu1 %v367_v7  ;;  %v343_v41 = vld [vmem:[#allocation8 + $0x130] sm:$0xff]  ;;  %v342_v45 = vld [vmem:[#allocation8 + $0x128] sm:$0xff]  ;;  %v341_v49 = vld [vmem:[#allocation8 + $0x120] sm:$0xff]  ;;  %v140_v3 = vshrl.u32 %v139_v2, 7 }
  0x5a   :  { %538 = vmatpush3.msra.mxu0 %v319_v8  ;;  %573 = vmatpush3.msra.mxu1 %v351_v9  ;;  %v324_v50 = vld [vmem:[#allocation8 + $0x98] sm:$0xff]  ;;  %v323_v54 = vld [vmem:[#allocation8 + $0x90] sm:$0xff]  ;;  %v322_v58 = vld [vmem:[#allocation8 + $0x88] sm:$0xff] }
  0x5b   :  { %539 = vmatprep.subr.mxu0 %v334_v10  ;;  %574 = vmatprep.subr.mxu1 %v366_v11  ;;  %v356_v51 = vld [vmem:[#allocation8 + $0x198] sm:$0xff]  ;;  %v355_v55 = vld [vmem:[#allocation8 + $0x190] sm:$0xff]  ;;  %v354_v59 = vld [vmem:[#allocation8 + $0x188] sm:$0xff]  ;;  %v149_v4 = vsub.s32 2, %v140_v3  ;;  %v141_v5 = vsub.s32 0, %v140_v3  ;;  %v145_v7 = vsub.s32 1, %v140_v3 }
  0x5c   :  { %540 = vmatpush3.msra.mxu0 %v318_v12  ;;  %575 = vmatpush3.msra.mxu1 %v350_v13  ;;  %v308_v52 = vld [vmem:[#allocation8 + $0x18] sm:$0xff]  ;;  %v307_v56 = vld [vmem:[#allocation8 + $0x10] sm:$0xff]  ;;  %v306_v60 = vld [vmem:[#allocation8 + $0x8] sm:$0xff]  ;;  %v153_v8 = vsub.s32 3, %v140_v3 }
  0x5d   :  { %541 = vmatprep.subr.mxu0 %v333_v14  ;;  %576 = vmatprep.subr.mxu1 %v365_v15  ;;  %v340_v53 = vld [vmem:[#allocation8 + $0x118] sm:$0xff]  ;;  %v339_v57 = vld [vmem:[#allocation8 + $0x110] sm:$0xff]  ;;  %v338_v61 = vld [vmem:[#allocation8 + $0x108] sm:$0xff] }
  0x5e   :  { %542 = vmatpush3.msra.mxu0 %v317_v16  ;;  %577 = vmatpush3.msra.mxu1 %v349_v17  ;;  %v321_v62 = vld [vmem:[#allocation8 + $0x80] sm:$0xff]  ;;  %v137_v6 = vld [vmem:[#allocation7] sm:$0xf] }
  0x5f   :  { %543 = vmatprep.subr.mxu0 %v332_v18  ;;  %578 = vmatprep.subr.mxu1 %v364_v19  ;;  %v353_v63 = vld [vmem:[#allocation8 + $0x180] sm:$0xff]  ;;  %v150_v9 = vrot.slane %v137_v6, %v149_v4  ;;  %v142_v10 = vrot.slane %v137_v6, %v141_v5  ;;  %v146_v11 = vrot.slane %v137_v6, %v145_v7 }
  0x60   :  { %544 = vmatpush3.msra.mxu0 %v316_v20  ;;  %579 = vmatpush3.msra.mxu1 %v348_v21  ;;  %v305_v0 = vld [vmem:[#allocation8] sm:$0xff]  ;;  %v154_v12 = vrot.slane %v137_v6, %v153_v8 }
  0x61   :  { %545 = vmatprep.subr.mxu0 %v331_v22  ;;  %580 = vmatprep.subr.mxu1 %v363_v23  ;;  %v337_v1 = vld [vmem:[#allocation8 + $0x100] sm:$0xff] }
  0x62   :  { %546 = vmatpush3.msra.mxu0 %v315_v24  ;;  %581 = vmatpush3.msra.mxu1 %v347_v25 }
  0x63   :  { %547 = vmatprep.subr.mxu0 %v330_v26  ;;  %582 = vmatprep.subr.mxu1 %v362_v27  ;;  %v534_v27 = vld [vmem:[%s785_s4] ss:$0 sm:$0xff] }
  0x64   :  { %548 = vmatpush3.msra.mxu0 %v314_v28  ;;  %583 = vmatpush3.msra.mxu1 %v346_v29 }
  0x65   :  { %549 = vmatprep.subr.mxu0 %v329_v30  ;;  %584 = vmatprep.subr.mxu1 %v361_v31 }
  0x66   :  { %550 = vmatpush3.msra.mxu0 %v313_v32  ;;  %585 = vmatpush3.msra.mxu1 %v345_v33 }
  0x67   :  { %551 = vmatprep.subr.mxu0 %v328_v34  ;;  %586 = vmatprep.subr.mxu1 %v360_v35 }
  0x68   :  { %552 = vmatpush3.msra.mxu0 %v312_v36  ;;  %587 = vmatpush3.msra.mxu1 %v344_v37 }
  0x69   :  { %553 = vmatprep.subr.mxu0 %v327_v38  ;;  %588 = vmatprep.subr.mxu1 %v359_v39 }
  0x6a   :  { %554 = vmatpush3.msra.mxu0 %v311_v40  ;;  %589 = vmatpush3.msra.mxu1 %v343_v41 }
  0x6b   :  { %555 = vmatprep.subr.mxu0 %v326_v42  ;;  %590 = vmatprep.subr.mxu1 %v358_v43 }
  0x6c   :  { %556 = vmatpush3.msra.mxu0 %v310_v44  ;;  %591 = vmatpush3.msra.mxu1 %v342_v45 }
  0x6d   :  { %557 = vmatprep.subr.mxu0 %v325_v46  ;;  %592 = vmatprep.subr.mxu1 %v357_v47 }
  0x6e   :  { %558 = vmatpush3.msra.mxu0 %v309_v48  ;;  %593 = vmatpush3.msra.mxu1 %v341_v49 }
  0x6f   :  { %559 = vmatprep.subr.mxu0 %v324_v50  ;;  %594 = vmatprep.subr.mxu1 %v356_v51 }
  0x70   :  { %560 = vmatpush3.msra.mxu0 %v308_v52  ;;  %595 = vmatpush3.msra.mxu1 %v340_v53 }
  0x71   :  { %561 = vmatprep.subr.mxu0 %v323_v54  ;;  %596 = vmatprep.subr.mxu1 %v355_v55 }
  0x72   :  { %562 = vmatpush3.msra.mxu0 %v307_v56  ;;  %597 = vmatpush3.msra.mxu1 %v339_v57 }
  0x73   :  { %563 = vmatprep.subr.mxu0 %v322_v58  ;;  %598 = vmatprep.subr.mxu1 %v354_v59 }
  0x74   :  { %564 = vmatpush3.msra.mxu0 %v306_v60  ;;  %599 = vmatpush3.msra.mxu1 %v338_v61 }
  0x75   :  { %565 = vmatprep.subr.mxu0 %v321_v62  ;;  %600 = vmatprep.subr.mxu1 %v353_v63 }
  0x76   :  { %566 = vmatpush3.msra.mxu0 %v305_v0  ;;  %601 = vmatpush3.msra.mxu1 %v337_v1 }
 0x116   :  { %v225_v13 = vpop.f32.mrf.mxu0  ;;  %v296_v14 = vpop.f32.mrf.mxu1 }
 0x117   :  { %v297_v15 = vadd.f32 %v296_v14, %v150_v9  ;;  %v226_v16 = vadd.f32 %v225_v13, %v142_v10 }
 0x118   :  { %v227_v17 = vpop.f32.mrf.mxu0  ;;  %v298_v18 = vpop.f32.mrf.mxu1 }
 0x119   :  { %v228_v19 = vadd.f32 %v227_v17, %v146_v11  ;;  %v299_v20 = vadd.f32 %v298_v18, %v154_v12  ;;  %v303_v21 = vmax.f32 %v297_v15, 0.0  ;;  %v301_v24 = vmax.f32 %v226_v16, 0.0 }
 0x11b   :  { %v302_v22 = vmax.f32 %v228_v19, 0.0  ;;  %v304_v23 = vmax.f32 %v299_v20, 0.0 }
 0x11d   :  { %440 = vmatprep.mubr.f32.mxu0 %v302_v22  ;;  %510 = vmatprep.mubr.f32.mxu1 %v304_v23 }
 0x11e   :  { %441 = vmatmul.mubr.f32.vlgmr.msra.gmra.mxu0 %v301_v24  ;;  %511 = vmatmul.mubr.f32.vlgmr.msra.gmra.mxu1 %v303_v21 }
 0x1de   :  { %v567_v25 = vpop.f32.mrf.mxu0  ;;  %v602_v26 = vpop.f32.mrf.mxu1 }
 0x1e0   :  { %v568_v28 = vpop.f32.mrf.mxu0  ;;  %v603_v29 = vpop.f32.mrf.mxu1 }
 0x1e1   :  { %v569_v30 = vadd.f32 %v568_v28, %v567_v25  ;;  %v604_v32 = vadd.f32 %v603_v29, %v602_v26 }
 0x1e3   :  { %v443_v31 = vadd.f32 %v569_v30, %v534_v27 }
 0x1e5   :  { %v513_v33 = vadd.f32 %v604_v32, %v443_v31 }
 0x1e7   :  { %516 = vst [vmem:[#allocation10] sm:$0xff] %v513_v33 }
 0x1e8   :  { %706 = shalt.err (!%p703_p10)
}
 0x1e9   :  { %526 = dma.vmem_to_hbm [thread:$0]  %s524_s16, 128, %s786_s5, [#allocation4]  }
 0x1ea   :  { %721 = dma.done.wait [#allocation4], 128  }
 0x1eb   :  { %722 = vsyncadd [#allocation4], 4294967168 }
 0x1ec   :  { %530 = vsyncpa [#allocation3], 1 }
 0x1ed   :  { %531 = vsyncpa [#allocation6], 1 }
 0x1ee   :  { %532 = vsyncpa [#allocation9], 1 }
 0x1ef   :  { %533 = vsyncpa [#allocation4], 1 }

</bundles_post_ra>
